<compile_context>
chip_gen: v5e
topology: v5e:2x2
jax: 0.10.0
libtpu: 0.0.40
codegen_flags: <defaults>
</compile_context>

<pallas_src>
import functools

import jax
import jax.numpy as jnp
from jax import lax
from jax.experimental import pallas as pl
from jax.experimental.pallas import tpu as pltpu

_MIB = 1024 * 1024


def _cdiv(a, b):
    return (a + b - 1) // b


def _roundup(a, b):
    return _cdiv(a, b) * b


def _vmem_input_budget_bytes():
    """Per-generation VMEM budget for the pipelined input buffers."""
    try:
        cap = int(pltpu.get_tpu_info().vmem_capacity_bytes)
    except Exception:
        cap = 0
    if cap <= 0:
        return 12 * _MIB                      # conservative fallback
    # v7x: 64 MiB/TC -> 24 MiB budget; v5e/v6e: 128 MiB -> capped at 36 MiB.
    return int(min(36 * _MIB, max(12 * _MIB, cap // 2 - 8 * _MIB)))


def _triplet_kernel(a_ref, p_ref, n_ref, out_ref, acc_ref, *, margin,
                    mining_type, batch, dim, block_b, block_d, mask_cols):
    i = pl.program_id(0)          # batch-block index
    k = pl.program_id(1)          # feature-block index
    nd = pl.num_programs(1)

    @pl.when(k == 0)
    def _():
        acc_ref[...] = jnp.zeros_like(acc_ref)

    a = a_ref[...].astype(jnp.float32)
    p = p_ref[...].astype(jnp.float32)
    n = n_ref[...].astype(jnp.float32)

    # Fused distance difference (single lane-reduction over this D tile):
    #   dist_pos - dist_neg = sum((a-p)^2 - (a-n)^2) = sum((p-n)*(p+n-2a))
    contrib = (p - n) * (p + n - 2.0 * a)
    if mask_cols:
        cols = lax.broadcasted_iota(jnp.int32, contrib.shape, 1) + k * block_d
        contrib = jnp.where(cols < dim, contrib, 0.0)
    acc_ref[...] += jnp.sum(contrib, axis=1, keepdims=True)      # (TB, 1)

    @pl.when(k == nd - 1)
    def _():
        base = acc_ref[...] + margin                              # (TB, 1)
        loss = jnp.maximum(base, 0.0)

        # Mask out padded rows of a (possibly partial) last batch tile.
        rows = lax.broadcasted_iota(jnp.int32, base.shape, 0)
        valid = (rows + i * block_b) < batch
        loss = jnp.where(valid, loss, 0.0)

        sum_all = jnp.sum(loss)

        if mining_type == 'semi-hard':
            # (d_neg > d_pos) & (d_neg < d_pos + margin)  <=>  0 < base < margin
            mask = jnp.logical_and(base > 0.0, base < margin)
            mask = jnp.logical_and(mask, valid)
            masked_sum = jnp.sum(jnp.where(mask, loss, 0.0))
            count = jnp.sum(mask.astype(jnp.float32))
        else:
            # 'hard' and 'all' share the plain-mean formula in the source module.
            masked_sum = jnp.float32(0.0)
            count = jnp.float32(0.0)

        # Lane-dense per-block partials: sublane 0 -> sum_all, 1 -> masked_sum,
        # 2 -> count (value replicated across all 128 lanes).
        srow = lax.broadcasted_iota(jnp.int32, (8, 128), 0)
        tile = jnp.where(srow == 0, sum_all,
                         jnp.where(srow == 1, masked_sum,
                                   jnp.where(srow == 2, count, 0.0)))
        out_ref[0] = tile


def hard_triplet_loss(anchor, positive, negative, *, margin=0.3,
                      mining_type='semi-hard', block_b=None, block_d=None,
                      input_dtype=None, target_step_bytes=16 * _MIB):
    assert mining_type in ('hard', 'semi-hard', 'all')
    assert anchor.shape == positive.shape == negative.shape
    B, D = anchor.shape

    # Optional narrow-dtype streaming (halves HBM traffic); kernel computes f32.
    if input_dtype is not None:
        anchor = anchor.astype(input_dtype)
        positive = positive.astype(input_dtype)
        negative = negative.astype(input_dtype)

    itemsize = jnp.dtype(anchor.dtype).itemsize
    sublane = {4: 8, 2: 16, 1: 32}.get(itemsize, 8)   # native row packing
    n_buf = 2                                          # BlockSpec double-buffer

    budget = _vmem_input_budget_bytes()
    d_pad = _roundup(D, 128)                           # lane-padded footprint

    # ----- feature-axis tiling (only when even a sublane-row tile won't fit) --
    if block_d is not None:
        td = max(128, (int(block_d) // 128) * 128)
        td = min(td, d_pad)
        if td >= D:
            td = D                                     # single full-D block
    elif 3 * n_buf * sublane * d_pad * itemsize <= budget:
        td = D                                         # common case: no D tiling
    else:
        td = (budget // (3 * n_buf * sublane * itemsize) // 128) * 128
        td = max(128, min(td, d_pad))
    d_tiled = td < D
    nd = _cdiv(D, td) if d_tiled else 1
    mask_cols = d_tiled and (D % td != 0)
    td_pad = _roundup(td, 128)
    bytes_per_row = 3 * td_pad * itemsize              # all 3 inputs, one row

    # ----- batch-axis tiling: bytes-per-step target, lane-padded budget -------
    if block_b is not None:
        tb = max(sublane, (int(block_b) // sublane) * sublane)
    else:
        tb_budget = max(sublane, budget // (n_buf * bytes_per_row))
        tb_target = max(sublane, _cdiv(target_step_bytes, bytes_per_row))
        tb = min(tb_budget, tb_target)
        tb = max(sublane, (tb // sublane) * sublane)
    if tb >= B:
        if B > sublane:
            # Guarantee >= 2 batch blocks so "parallel" can use both v7x cores.
            tb = _roundup(_cdiv(B, 2), sublane)
        else:
            tb = B                                     # full-dim block (legal)
    nb = _cdiv(B, tb)

    kernel = functools.partial(
        _triplet_kernel, margin=float(margin), mining_type=mining_type,
        batch=B, dim=D, block_b=tb, block_d=td, mask_cols=mask_cols)

    vmem_limit = int(budget + 16 * _MIB)

    partials = pl.pallas_call(
        kernel,
        out_shape=jax.ShapeDtypeStruct((nb, 8, 128), jnp.float32),
        grid_spec=pltpu.PrefetchScalarGridSpec(
            num_scalar_prefetch=0,
            grid=(nb, nd),
            in_specs=[
                pl.BlockSpec((tb, td), lambda i, k: (i, k)),
                pl.BlockSpec((tb, td), lambda i, k: (i, k)),
                pl.BlockSpec((tb, td), lambda i, k: (i, k)),
            ],
            out_specs=pl.BlockSpec((1, 8, 128), lambda i, k: (i, 0, 0)),
            scratch_shapes=[pltpu.VMEM((tb, 1), jnp.float32)],
        ),
        compiler_params=pltpu.CompilerParams(
            dimension_semantics=("parallel", "arbitrary"),
            vmem_limit_bytes=vmem_limit),
        cost_estimate=pl.CostEstimate(
            flops=int(5 * B * D),
            transcendentals=0,
            bytes_accessed=int(3 * B * D * itemsize + nb * 8 * 128 * 4)),
    )(anchor, positive, negative)

    # Final (tiny) reduction + normalization in plain JAX.
    sum_all = jnp.sum(partials[:, 0, 0])
    mean_all = sum_all / B
    if mining_type == 'semi-hard':
        masked_sum = jnp.sum(partials[:, 1, 0])
        count = jnp.sum(partials[:, 2, 0])
        mean_masked = masked_sum / jnp.maximum(count, 1.0)
        return jnp.where(count > 0.0, mean_masked, mean_all)
    return mean_all


def _reference(anchor, positive, negative, margin=0.3, mining_type='semi-hard'):
    # Pure-JAX reference mirroring the PyTorch module semantics (unfused).
    dist_pos = jnp.sum((anchor - positive) ** 2, axis=1)
    dist_neg = jnp.sum((anchor - negative) ** 2, axis=1)
    loss_all = jnp.maximum(dist_pos - dist_neg + margin, 0.0)
    if mining_type == 'semi-hard':
        mask = (dist_neg > dist_pos) & (dist_neg < dist_pos + margin)
        count = jnp.sum(mask.astype(jnp.float32))
        mean_masked = jnp.sum(loss_all * mask) / jnp.maximum(count, 1.0)
        return jnp.where(count > 0, mean_masked, jnp.mean(loss_all))
    return jnp.mean(loss_all)


if __name__ == "__main__":
    key = jax.random.PRNGKey(0)
    k1, k2, k3 = jax.random.split(key, 3)

    # Primary shapes: B deliberately not a multiple of 8 to exercise row masking.
    B, D = 20, 32
    anchor = jax.random.normal(k1, (B, D), dtype=jnp.float32)
    positive = anchor + 0.05 * jax.random.normal(k2, (B, D), dtype=jnp.float32)
    negative = anchor + 0.15 * jax.random.normal(k3, (B, D), dtype=jnp.float32)

    configs = [
        ('semi-hard', 1.0),   # semi-hard triplets present -> masked-mean path
        ('semi-hard', 0.01),  # likely no semi-hard triplets -> fallback path
        ('hard', 1.0),
        ('all', 1.0),
    ]
    for mt, margin in configs:
        # block_b=None: auto tile (>=2 blocks for megacore); block_b=8 forces a
        # multi-tile grid with a partial remainder tile (20 = 8 + 8 + 4).
        for blk in (None, 8):
            loss = hard_triplet_loss(anchor, positive, negative,
                                     margin=margin, mining_type=mt,
                                     block_b=blk)
            loss = jax.block_until_ready(loss)
            ref = _reference(anchor, positive, negative, margin, mt)
            assert jnp.allclose(loss, ref, atol=1e-4, rtol=1e-4), \
                (mt, margin, blk, float(loss), float(ref))

    # D-tiled accumulator fallback path (block_d=128 -> 3 feature blocks,
    # last one partial -> exercises column masking + the VMEM accumulator).
    B2, D2 = 16, 300
    a2 = jax.random.normal(k1, (B2, D2), dtype=jnp.float32)
    p2 = a2 + 0.05 * jax.random.normal(k2, (B2, D2), dtype=jnp.float32)
    n2 = a2 + 0.15 * jax.random.normal(k3, (B2, D2), dtype=jnp.float32)
    for mt in ('semi-hard', 'all'):
        loss = hard_triplet_loss(a2, p2, n2, margin=7.0, mining_type=mt,
                                 block_d=128)
        loss = jax.block_until_ready(loss)
        ref = _reference(a2, p2, n2, 7.0, mt)
        assert jnp.allclose(loss, ref, atol=1e-4, rtol=1e-4), \
            (mt, float(loss), float(ref))

    # bf16 input streaming (halved HBM traffic; f32 compute in-kernel).
    a16 = anchor.astype(jnp.bfloat16).astype(jnp.float32)
    p16 = positive.astype(jnp.bfloat16).astype(jnp.float32)
    n16 = negative.astype(jnp.bfloat16).astype(jnp.float32)
    loss = hard_triplet_loss(anchor, positive, negative, margin=1.0,
                             mining_type='all', input_dtype=jnp.bfloat16)
    loss = jax.block_until_ready(loss)
    ref = _reference(a16, p16, n16, 1.0, 'all')
    assert jnp.allclose(loss, ref, atol=1e-3, rtol=1e-3), (float(loss), float(ref))

    print("KERNEL_OK")
</pallas_src>

<mosaic_0001>
module attributes {stable_mosaic.version = 11 : i64} {
  func.func @_triplet_kernel(%arg0: i32, %arg1: i32, %arg2: memref<16x32xf32, #tpu.memory_space<vmem>>, %arg3: memref<16x32xf32, #tpu.memory_space<vmem>>, %arg4: memref<16x32xf32, #tpu.memory_space<vmem>>, %arg5: memref<1x8x128xf32, #tpu.memory_space<vmem>>, %arg6: memref<16x1xf32, #tpu.memory_space<vmem>>) attributes {dimension_semantics = [#tpu.dimension_semantics<parallel>, #tpu.dimension_semantics<arbitrary>], iteration_bounds = array<i64: 2, 1>, scalar_prefetch = 0 : i64, scratch_operands = 1 : i64, tpu.core_type = #tpu.core_type<tc>, window_params = [{transform_indices = @transform_0, window_bounds = array<i64: 16, 32>}, {transform_indices = @transform_1, window_bounds = array<i64: 16, 32>}, {transform_indices = @transform_2, window_bounds = array<i64: 16, 32>}, {transform_indices = @transform_3, window_bounds = array<i64: 1, 8, 128>}]} {
    %c0_i32 = arith.constant 0 : i32
    %0 = arith.cmpi eq, %arg1, %c0_i32 : i32
    %1 = arith.extui %0 : i1 to i32
    %c0_i32_0 = arith.constant 0 : i32
    %2 = arith.cmpi ne, %1, %c0_i32_0 : i32
    scf.if %2 {
      %cst_13 = arith.constant 0.000000e+00 : f32
      %20 = vector.broadcast %cst_13 : f32 to vector<16x1xf32>
      %c0_14 = arith.constant 0 : index
      %c0_15 = arith.constant 0 : index
      %21 = vector.load %arg6[%c0_14, %c0_15] : memref<16x1xf32, #tpu.memory_space<vmem>>, vector<16x1xf32>
      tpu.vector_store %arg6[%c0_14, %c0_15], %20 {strides = array<i32>} : memref<16x1xf32, #tpu.memory_space<vmem>>, vector<16x1xf32>,
    } else {
    }
    %c0 = arith.constant 0 : index
    %c0_1 = arith.constant 0 : index
    %3 = vector.load %arg2[%c0, %c0_1] : memref<16x32xf32, #tpu.memory_space<vmem>>, vector<16x32xf32>
    %c0_2 = arith.constant 0 : index
    %c0_3 = arith.constant 0 : index
    %4 = vector.load %arg3[%c0_2, %c0_3] : memref<16x32xf32, #tpu.memory_space<vmem>>, vector<16x32xf32>
    %c0_4 = arith.constant 0 : index
    %c0_5 = arith.constant 0 : index
    %5 = vector.load %arg4[%c0_4, %c0_5] : memref<16x32xf32, #tpu.memory_space<vmem>>, vector<16x32xf32>
    %6 = arith.subf %4, %5 : vector<16x32xf32>
    %7 = arith.addf %4, %5 : vector<16x32xf32>
    %cst = arith.constant 2.000000e+00 : f32
    %8 = vector.broadcast %cst : f32 to vector<16x32xf32>
    %9 = arith.mulf %8, %3 : vector<16x32xf32>
    %10 = arith.subf %7, %9 : vector<16x32xf32>
    %11 = arith.mulf %6, %10 : vector<16x32xf32>
    %c0_6 = arith.constant 0 : index
    %c0_7 = arith.constant 0 : index
    %12 = vector.load %arg6[%c0_6, %c0_7] : memref<16x1xf32, #tpu.memory_space<vmem>>, vector<16x1xf32>
    %cst_8 = arith.constant dense<0.000000e+00> : vector<16xf32>
    %13 = vector.multi_reduction <add>, %11, %cst_8 [1] : vector<16x32xf32> to vector<16xf32>
    %14 = vector.shape_cast %13 : vector<16xf32> to vector<16x1xf32>
    %15 = arith.addf %12, %14 : vector<16x1xf32>
    %c0_9 = arith.constant 0 : index
    %c0_10 = arith.constant 0 : index
    %16 = vector.load %arg6[%c0_9, %c0_10] : memref<16x1xf32, #tpu.memory_space<vmem>>, vector<16x1xf32>
    tpu.vector_store %arg6[%c0_9, %c0_10], %15 {strides = array<i32>} : memref<16x1xf32, #tpu.memory_space<vmem>>, vector<16x1xf32>,
    %c0_i32_11 = arith.constant 0 : i32
    %17 = arith.cmpi eq, %arg1, %c0_i32_11 : i32
    %18 = arith.extui %17 : i1 to i32
    %c0_i32_12 = arith.constant 0 : i32
    %19 = arith.cmpi ne, %18, %c0_i32_12 : i32
    scf.if %19 {
      %c0_13 = arith.constant 0 : index
      %c0_14 = arith.constant 0 : index
      %20 = vector.load %arg6[%c0_13, %c0_14] : memref<16x1xf32, #tpu.memory_space<vmem>>, vector<16x1xf32>
      %cst_15 = arith.constant 1.000000e+00 : f32
      %21 = vector.broadcast %cst_15 : f32 to vector<16x1xf32>
      %22 = arith.addf %20, %21 : vector<16x1xf32>
      %cst_16 = arith.constant 0.000000e+00 : f32
      %23 = vector.broadcast %cst_16 : f32 to vector<16x1xf32>
      %24 = arith.maximumf %22, %23 : vector<16x1xf32>
      %25 = tpu.iota {dimensions = array<i32: 0>} : vector<16x1xi32>
      %c16_i32 = arith.constant 16 : i32
      %26 = arith.muli %arg0, %c16_i32 : i32
      %27 = vector.broadcast %26 : i32 to vector<16x1xi32>
      %28 = arith.addi %25, %27 : vector<16x1xi32>
      %c20_i32 = arith.constant 20 : i32
      %29 = vector.broadcast %c20_i32 : i32 to vector<16x1xi32>
      %30 = arith.cmpi slt, %28, %29 : vector<16x1xi32>
      %cst_17 = arith.constant 0.000000e+00 : f32
      %31 = vector.broadcast %cst_17 : f32 to vector<16x1xf32>
      %32 = arith.select %30, %24, %31 : vector<16x1xi1>, vector<16x1xf32>
      %33 = vector.shape_cast %32 : vector<16x1xf32> to vector<1x16x1xf32>
      %cst_18 = arith.constant dense<0.000000e+00> : vector<1xf32>
      %34 = vector.multi_reduction <add>, %33, %cst_18 [1, 2] : vector<1x16x1xf32> to vector<1xf32>
      %35 = vector.shape_cast %34 : vector<1xf32> to vector<1x1x1xf32>
      %36 = vector.extract %35[0, 0, 0] : f32 from vector<1x1x1xf32>
      %cst_19 = arith.constant 0.000000e+00 : f32
      %37 = vector.broadcast %cst_19 : f32 to vector<16x1xf32>
      %38 = arith.cmpf ogt, %22, %37 : vector<16x1xf32>
      %cst_20 = arith.constant 1.000000e+00 : f32
      %39 = vector.broadcast %cst_20 : f32 to vector<16x1xf32>
      %40 = arith.cmpf olt, %22, %39 : vector<16x1xf32>
      %41 = arith.andi %38, %40 : vector<16x1xi1>
      %42 = arith.andi %41, %30 : vector<16x1xi1>
      %cst_21 = arith.constant 0.000000e+00 : f32
      %43 = vector.broadcast %cst_21 : f32 to vector<16x1xf32>
      %44 = arith.select %42, %32, %43 : vector<16x1xi1>, vector<16x1xf32>
      %45 = vector.shape_cast %44 : vector<16x1xf32> to vector<1x16x1xf32>
      %cst_22 = arith.constant dense<0.000000e+00> : vector<1xf32>
      %46 = vector.multi_reduction <add>, %45, %cst_22 [1, 2] : vector<1x16x1xf32> to vector<1xf32>
      %47 = vector.shape_cast %46 : vector<1xf32> to vector<1x1x1xf32>
      %48 = vector.extract %47[0, 0, 0] : f32 from vector<1x1x1xf32>
      %49 = arith.extui %42 : vector<16x1xi1> to vector<16x1xi32>
      %50 = arith.sitofp %49 : vector<16x1xi32> to vector<16x1xf32>
      %51 = vector.shape_cast %50 : vector<16x1xf32> to vector<1x16x1xf32>
      %cst_23 = arith.constant dense<0.000000e+00> : vector<1xf32>
      %52 = vector.multi_reduction <add>, %51, %cst_23 [1, 2] : vector<1x16x1xf32> to vector<1xf32>
      %53 = vector.shape_cast %52 : vector<1xf32> to vector<1x1x1xf32>
      %54 = vector.extract %53[0, 0, 0] : f32 from vector<1x1x1xf32>
      %55 = tpu.iota {dimensions = array<i32: 0>} : vector<8x128xi32>
      %c0_i32_24 = arith.constant 0 : i32
      %56 = vector.broadcast %c0_i32_24 : i32 to vector<8x128xi32>
      %57 = arith.cmpi eq, %55, %56 : vector<8x128xi32>
      %c1_i32 = arith.constant 1 : i32
      %58 = vector.broadcast %c1_i32 : i32 to vector<8x128xi32>
      %59 = arith.cmpi eq, %55, %58 : vector<8x128xi32>
      %c2_i32 = arith.constant 2 : i32
      %60 = vector.broadcast %c2_i32 : i32 to vector<8x128xi32>
      %61 = arith.cmpi eq, %55, %60 : vector<8x128xi32>
      %cst_25 = arith.constant 0.000000e+00 : f32
      %62 = vector.broadcast %54 : f32 to vector<8x128xf32>
      %63 = vector.broadcast %cst_25 : f32 to vector<8x128xf32>
      %64 = arith.select %61, %62, %63 : vector<8x128xi1>, vector<8x128xf32>
      %65 = vector.broadcast %48 : f32 to vector<8x128xf32>
      %66 = arith.select %59, %65, %64 : vector<8x128xi1>, vector<8x128xf32>
      %67 = vector.broadcast %36 : f32 to vector<8x128xf32>
      %68 = arith.select %57, %67, %66 : vector<8x128xi1>, vector<8x128xf32>
      %c0_26 = arith.constant 0 : index
      %c0_27 = arith.constant 0 : index
      %c0_28 = arith.constant 0 : index
      %69 = vector.load %arg5[%c0_26, %c0_27, %c0_28] : memref<1x8x128xf32, #tpu.memory_space<vmem>>, vector<1x8x128xf32>
      %70 = vector.shape_cast %69 : vector<1x8x128xf32> to vector<8x128xf32>
      %71 = vector.shape_cast %68 : vector<8x128xf32> to vector<1x8x128xf32>
      tpu.vector_store %arg5[%c0_26, %c0_27, %c0_28], %71 {strides = array<i32>} : memref<1x8x128xf32, #tpu.memory_space<vmem>>, vector<1x8x128xf32>,
    } else {
    }
    return
  }
  func.func @transform_0(%arg0: i32, %arg1: i32) -> (i32, i32) {
    %c0_i32 = arith.constant 0 : i32
    return %arg0, %arg1 : i32, i32
  }
  func.func @transform_1(%arg0: i32, %arg1: i32) -> (i32, i32) {
    %c0_i32 = arith.constant 0 : i32
    return %arg0, %arg1 : i32, i32
  }
  func.func @transform_2(%arg0: i32, %arg1: i32) -> (i32, i32) {
    %c0_i32 = arith.constant 0 : i32
    return %arg0, %arg1 : i32, i32
  }
  func.func @transform_3(%arg0: i32, %arg1: i32) -> (i32, i32, i32) {
    %c0_i32 = arith.constant 0 : i32
    %c0_i32_0 = arith.constant 0 : i32
    %c0_i32_1 = arith.constant 0 : i32
    return %arg0, %c0_i32, %c0_i32_0 : i32, i32, i32
  }
}

</mosaic_0001>

<bundles_post_ra>
// kernel: tpu_custom_call.1
= control target key start
LH: loop header
LB: loop body
LE: loop exit
PB: predicated region body
PF: predicated region fallthrough
CT: control target
= control target key end

     0   :  { %8 = vsyncpa [#allocation4], 0  ;;  %s1219_s0 = inlined_call_operand.hbm [shape: f32[20,32], index: 0, kind: input, shape index: {}]   ;;  %s1220_s1 = inlined_call_operand.hbm [shape: f32[20,32], index: 1, kind: input, shape index: {}]   ;;  %s1221_s2 = inlined_call_operand.hbm [shape: f32[20,32], index: 2, kind: input, shape index: {}]   ;;  %s1222_s3 = inlined_call_operand.hbm [shape: f32[2,8,128], index: 3, kind: output, shape index: {}]  }
   0x1   :  { %10 = vsyncpa [#allocation4 + $0x1], 0 }
   0x2   :  { %11 = vsyncpa [#allocation7], 0 }
   0x3   :  { %13 = vsyncpa [#allocation7 + $0x1], 0 }
   0x4   :  { %14 = vsyncpa [#allocation5], 0 }
   0x5   :  { %16 = vsyncpa [#allocation5 + $0x1], 0  ;;  %s935_s12 = smov 0   ;;  %s937_s13 = smov 0  }
   0x6   :  { %s939_s14 = smov 0   ;;  %s941_s15 = smov 0  }
   0x7   :  { %s943_s16 = smov 0   ;;  %s945_s17 = smov 0  }
   0x8 LB: > { %s966_s18 = sadd.s32 4294967295, %s903_s17   ;;  %s590_s19 = sadd.s32 4294967294, %s903_s17   ;;  %s903_s17 = sphi %s945_s17, %s22_s17   ;;  %s899_s16 = sphi %s943_s16, %s1240_s16   ;;  %s895_s15 = sphi %s941_s15, %s1239_s15   ;;  %s891_s14 = sphi %s939_s14, %s1238_s14   ;;  %s887_s13 = sphi %s937_s13, %s1237_s13   ;;  %s883_s12 = sphi %s935_s12, %s1236_s12  }
   0x9   : > { %s34_s20 = sadd.s32 1, %s899_s16  ;;  %s43_s21 = sadd.s32 1, %s891_s14 }
   0xa   : > { %p36_p0 = scmp.ge.s32.totalorder %s34_s20, 2  ;;  %p50_p1 = scmp.ne.s32.totalorder %s891_s14, %s887_s13 }
   0xb   : > { %p51_p2 = scmp.eq.s32.totalorder %s903_s17, 0  ;;  %p56_p3 = scmp.ne.s32.totalorder %s887_s13, %s883_s12 }
   0xc   : > { %s1242_s20 = smov (%p36_p0, %s34_s20), 0  ;;  %p57_p5 = scmp.eq.s32.totalorder %s966_s18, 0 }
   0xd   : > { %p978_p4 = por %p51_p2, %p50_p1  ;;  %s38_s23 = ssub.s32 %s899_s16, %s1242_s20 }
   0xe   : > { %p136_p6 = scmp.eq.s32.totalorder %s966_s18, 1  ;;  %p41_p7 = scmp.eq.s32.totalorder %s38_s23, 0 }
   0xf   : > { %p986_p8 = por %p57_p5, %p56_p3  ;;  %p142_p10 = scmp.eq.s32.totalorder %s590_s19, 1 }
  0x10   : > { %p990_p9 = por %p136_p6, %p50_p1  ;;  %p592_p12 = scmp.ge.s32.totalorder %s903_s17, 2 }
  0x11   : > { %s995_s26 = scalar_select %p41_p7, %s891_s14, %s43_s21  }
  0x12   : > { %p997_p11 = por %p142_p10, %p56_p3  ;;  %158 = sbr.rel (%p592_p12) target bundleno = 133 (0x85), region = 16 }
  0x17   : > { %161 = sbr.rel (!%p978_p4) target bundleno = 60 (0x3c), region = 20  ;;  %s162_s28 = sand.u32 (%p978_p4), 1, %s891_s14  }
  0x18   : > { %s594_s29 = sshll.u32 (%p978_p4), %s899_s16, 1  ;;  %s593_s30 = sshll.u32 (%p978_p4), %s162_s28, 4 }
  0x19   : > { %s168_s4 = ssub.s32 (%p978_p4), 3, %s594_s29  ;;  %s1011_s8 = scalar_lea.sflag (%p978_p4), [#allocation4], %s162_s28 }
  0x1a   : > { %p169_p13 = scmp.lt.s32.totalorder (%p978_p4), %s168_s4, 2  ;;  %s166_s9 = scalar_lea.vmem (%p978_p4), [#allocation3], %s593_s30 }
  0x1c   : > { %s1244_s4 = smov (!%p169_p13, %s168_s4), 2 }
  0x1d   : > { %s595_s5 = sshll.u32 %s1244_s4, 3 }
  0x1e   : > { %s172_s6 = ssub.s32 16, %s595_s5 }
  0x1f   : > { %s173_s7 = sshll.u32 %s172_s6, 4 }
  0x20   : > { %174 = vsyncadd %s1011_s8, %s173_s7  ;;  %p1014_p0 = scmp.ne.s32.totalorder %s595_s5, 0  ;;  %s626_s11 = sshll.u32 %s899_s16, 4 }
  0x21   : > { %s178_s23 = scalar_lea.hbm %s1219_s0, %s626_s11  ;;  %s1022_s29 = sshll.u32 %s166_s9, 4  ;;  %s183_s29 = int_to_ptr.vmem [resolvable:$true] %s1022_s29 }
  0x22   : > { %s180_s28 = sshll.u32 %s178_s23, 4  ;;  %s1223_s30 = sshll.u32 %s1244_s4, 7  ;;  %s1025_s28 = int_to_ptr.hbm [resolvable:$true] %s180_s28 }
  0x23   : > { %s700_s6 = sshra.s32 %s1025_s28, 4  ;;  %s702_s5 = sshrl.u32 %s1223_s30, 4  ;;  %s701_s6 = int_to_ptr.hbm [resolvable:$true] %s700_s6 }
  0x24   : > { %s707_s7 = scalar_lea.hbm %s701_s6, %s702_s5  ;;  %s711_s9 = scalar_lea.hbm %s1219_s0, 24 }
  0x25   : > { %p708_p1 = scmp.ne.s32.totalorder %s701_s6, %s707_s7  ;;  %p713_p5 = scmp.lt.s32.totalorder %s711_s9, %s707_s7 }
  0x27   : > { %p709_p2 = pnand %p708_p1, %p1014_p0 }
  0x29   : > { %p710_p3 = pneg %p709_p2 }
  0x2b   : > { %p715_p6 = pnand %p713_p5, %p710_p3 }
  0x2d   : > { %718 = shalt.err (!%p715_p6)
}
  0x2e   : > { %s719_s21 = sshra.s32 %s183_s29, 4  ;;  %s905_s6 = smov [#allocation3]   ;;  %s720_s21 = int_to_ptr.vmem [resolvable:$true] %s719_s21 }
  0x2f   : > { %s726_s23 = scalar_lea.vmem %s720_s21, %s702_s5  ;;  %s730_s30 = scalar_lea.vmem %s905_s6, 32 }
  0x30   : > { %p727_p7 = scmp.ne.s32.totalorder %s720_s21, %s726_s23  ;;  %p732_p1 = scmp.lt.s32.totalorder %s730_s30, %s726_s23 }
  0x32   : > { %p728_p10 = pnand %p727_p7, %p1014_p0 }
  0x34   : > { %p729_p13 = pneg %p728_p10 }
  0x36   : > { %p734_p2 = pnand %p732_p1, %p729_p13 }
  0x38   : > { %737 = shalt.err (!%p734_p2)
}
  0x39   : > { %s906_s19 = smov 128   ;;  %s907_s7 = smov 8  }
  0x3a   : > { %s1230_s11 = sshll.u32 %s1244_s4, 7 }
  0x3b   : > { %188 = dma.hbm_to_vmem [thread:$0]  (%p1014_p0), %s1025_s28, %s1230_s11, %s183_s29, %s1011_s8, %s906_s19, %s906_s19, %s907_s7  }
  0x3c PF: > { %191 = sbr.rel (!%p978_p4) target bundleno = 97 (0x61), region = 24  ;;  %s192_s30 = sand.u32 (%p978_p4), 1, %s903_s17  }
  0x3d   : > { %s194_s5 = sand.u32 (%p978_p4), 1, %s891_s14   ;;  %s601_s21 = sshll.u32 (%p978_p4), %s899_s16, 1 }
  0x3e   : > { %s600_s9 = sshll.u32 (%p978_p4), %s194_s5, 4  ;;  %s198_s23 = ssub.s32 (%p978_p4), 3, %s601_s21 }
  0x3f   : > { %p199_p3 = scmp.lt.s32.totalorder (%p978_p4), %s198_s23, 2  ;;  %s1056_s8 = scalar_lea.sflag (%p978_p4), [#allocation7], %s192_s30 }
  0x40   : > { %s196_s29 = scalar_lea.vmem (%p978_p4), [#allocation6], %s600_s9 }
  0x41   : > { %s1246_s23 = smov (!%p199_p3, %s198_s23), 2 }
  0x42   : > { %s602_s10 = sshll.u32 %s1246_s23, 3 }
  0x43   : > { %s202_s6 = ssub.s32 16, %s602_s10 }
  0x44   : > { %s203_s4 = sshll.u32 %s202_s6, 4 }
  0x45   : > { %204 = vsyncadd %s1056_s8, %s203_s4  ;;  %p1059_p0 = scmp.ne.s32.totalorder %s602_s10, 0  ;;  %s627_s19 = sshll.u32 %s899_s16, 4 }
  0x46   : > { %s208_s5 = scalar_lea.hbm %s1220_s1, %s627_s19  ;;  %s1067_s21 = sshll.u32 %s196_s29, 4  ;;  %s213_s21 = int_to_ptr.vmem [resolvable:$true] %s1067_s21 }
  0x47   : > { %s210_s30 = sshll.u32 %s208_s5, 4  ;;  %s1224_s9 = sshll.u32 %s1246_s23, 7  ;;  %s1070_s30 = int_to_ptr.hbm [resolvable:$true] %s210_s30 }
  0x48   : > { %s739_s6 = sshra.s32 %s1070_s30, 4  ;;  %s741_s10 = sshrl.u32 %s1224_s9, 4  ;;  %s740_s6 = int_to_ptr.hbm [resolvable:$true] %s739_s6 }
  0x49   : > { %s746_s4 = scalar_lea.hbm %s740_s6, %s741_s10  ;;  %s750_s29 = scalar_lea.hbm %s1220_s1, 24 }
  0x4a   : > { %p747_p5 = scmp.ne.s32.totalorder %s740_s6, %s746_s4  ;;  %p752_p10 = scmp.lt.s32.totalorder %s750_s29, %s746_s4 }
  0x4c   : > { %p748_p6 = pnand %p747_p5, %p1059_p0 }
  0x4e   : > { %p749_p7 = pneg %p748_p6 }
  0x50   : > { %p754_p13 = pnand %p752_p10, %p749_p7 }
  0x52   : > { %757 = shalt.err (!%p754_p13)
}
  0x53   : > { %s758_s11 = sshra.s32 %s213_s21, 4  ;;  %s908_s6 = smov [#allocation6]   ;;  %s759_s11 = int_to_ptr.vmem [resolvable:$true] %s758_s11 }
  0x54   : > { %s765_s5 = scalar_lea.vmem %s759_s11, %s741_s10  ;;  %s769_s9 = scalar_lea.vmem %s908_s6, 32 }
  0x55   : > { %p766_p1 = scmp.ne.s32.totalorder %s759_s11, %s765_s5  ;;  %p771_p5 = scmp.lt.s32.totalorder %s769_s9, %s765_s5 }
  0x57   : > { %p767_p2 = pnand %p766_p1, %p1059_p0 }
  0x59   : > { %p768_p3 = pneg %p767_p2 }
  0x5b   : > { %p773_p6 = pnand %p771_p5, %p768_p3 }
  0x5d   : > { %776 = shalt.err (!%p773_p6)
}
  0x5e   : > { %s909_s7 = smov 128   ;;  %s910_s4 = smov 8  }
  0x5f   : > { %s1232_s19 = sshll.u32 %s1246_s23, 7 }
  0x60   : > { %218 = dma.hbm_to_vmem [thread:$0]  (%p1059_p0), %s1070_s30, %s1232_s19, %s213_s21, %s1056_s8, %s909_s7, %s909_s7, %s910_s4  }
  0x61 PF: > { %221 = sbr.rel (!%p978_p4) target bundleno = 133 (0x85), region = 28  ;;  %s222_s9 = sand.u32 (%p978_p4), 1, %s903_s17  }
  0x62   : > { %s224_s10 = sand.u32 (%p978_p4), 1, %s891_s14   ;;  %s608_s11 = sshll.u32 (%p978_p4), %s899_s16, 1 }
  0x63   : > { %s607_s29 = sshll.u32 (%p978_p4), %s224_s10, 4  ;;  %s228_s5 = ssub.s32 (%p978_p4), 3, %s608_s11 }
  0x64   : > { %p229_p7 = scmp.lt.s32.totalorder (%p978_p4), %s228_s5, 2  ;;  %s1101_s8 = scalar_lea.sflag (%p978_p4), [#allocation7], %s222_s9 }
  0x65   : > { %s226_s22 = scalar_lea.vmem (%p978_p4), [#allocation8], %s607_s29 }
  0x66   : > { %s1248_s5 = smov (!%p229_p7, %s228_s5), 2 }
  0x67   : > { %s609_s28 = sshll.u32 %s1248_s5, 3 }
  0x68   : > { %s232_s6 = ssub.s32 16, %s609_s28 }
  0x69   : > { %s233_s23 = sshll.u32 %s232_s6, 4 }
  0x6a   : > { %234 = vsyncadd %s1101_s8, %s233_s23  ;;  %p1104_p4 = scmp.ne.s32.totalorder %s609_s28, 0  ;;  %s628_s30 = sshll.u32 %s899_s16, 4 }
  0x6b   : > { %s238_s19 = scalar_lea.hbm %s1221_s2, %s628_s30  ;;  %s1112_s10 = sshll.u32 %s226_s22, 4  ;;  %s243_s10 = int_to_ptr.vmem [resolvable:$true] %s1112_s10 }
  0x6c   : > { %s240_s9 = sshll.u32 %s238_s19, 4  ;;  %s613_s29 = sshll.u32 %s1248_s5, 7  ;;  %s1115_s9 = int_to_ptr.hbm [resolvable:$true] %s240_s9 }
  0x6d   : > { %s778_s11 = sshra.s32 %s1115_s9, 4  ;;  %s780_s28 = sshrl.u32 %s613_s29, 4  ;;  %s779_s11 = int_to_ptr.hbm [resolvable:$true] %s778_s11 }
  0x6e   : > { %s785_s6 = scalar_lea.hbm %s779_s11, %s780_s28  ;;  %s789_s22 = scalar_lea.hbm %s1221_s2, 24 }
  0x6f   : > { %p786_p0 = scmp.ne.s32.totalorder %s779_s11, %s785_s6  ;;  %p791_p1 = scmp.lt.s32.totalorder %s789_s22, %s785_s6 }
  0x71   : > { %p787_p10 = pnand %p786_p0, %p1104_p4 }
  0x73   : > { %p788_p13 = pneg %p787_p10 }
  0x75   : > { %p793_p2 = pnand %p791_p1, %p788_p13 }
  0x77   : > { %796 = shalt.err (!%p793_p2)
}
  0x78   : > { %s797_s7 = sshra.s32 %s243_s10, 4  ;;  %s911_s19 = smov [#allocation8]   ;;  %s798_s7 = int_to_ptr.vmem [resolvable:$true] %s797_s7 }
  0x79   : > { %s804_s4 = scalar_lea.vmem %s798_s7, %s780_s28  ;;  %s808_s11 = scalar_lea.vmem %s911_s19, 32 }
  0x7a   : > { %p805_p3 = scmp.ne.s32.totalorder %s798_s7, %s804_s4  ;;  %p810_p7 = scmp.lt.s32.totalorder %s808_s11, %s804_s4 }
  0x7c   : > { %p806_p5 = pnand %p805_p3, %p1104_p4 }
  0x7e   : > { %p807_p6 = pneg %p806_p5 }
  0x80   : > { %p812_p0 = pnand %p810_p7, %p807_p6 }
  0x82   : > { %815 = shalt.err (!%p812_p0)
}
  0x83   : > { %s912_s23 = smov 128   ;;  %s913_s6 = smov 8  }
  0x84   : > { %248 = dma.hbm_to_vmem [thread:$0]  (%p1104_p4), %s1115_s9, %s613_s29, %s243_s10, %s1101_s8, %s912_s23, %s912_s23, %s913_s6  }
  0x85 PF: > { %p614_p10 = scmp.ge.s32.totalorder %s903_s17, 1  ;;  %p250_p13 = scmp.lt.s32.totalorder %s903_s17, 3 }
  0x87   : > { %p251_p1 = pnand %p614_p10, %p250_p13 }
  0x88   : > { %s1141_s28 = sand.u32 (!%p251_p1), 1, %s887_s13  }
  0x89   : > { %254 = sbr.rel (%p251_p1) target bundleno = 492 (0x1ec), region = 32  ;;  %s615_s30 = sshll.u32 (!%p251_p1), %s1141_s28, 4 }
  0x8a   : > { %s257_s22 = scalar_lea.sflag (!%p251_p1), [#allocation4], %s1141_s28  ;;  %s260_s21 = scalar_lea.vmem (!%p251_p1), [#allocation3], %s615_s30 }
  0x8e   : > { %870 = dma.done.wait (%p986_p8), %s257_s22, 256  }
  0x8f   : > { %872 = vsyncadd (%p986_p8), %s257_s22, 4294967040  ;;  %s266_s5 = sand.u32 1, %s966_s18   ;;  %s270_s10 = scalar_lea.vmem [#allocation6], %s615_s30 }
  0x90   : > { %s267_s8 = scalar_lea.sflag [#allocation7], %s266_s5 }
  0x91   : > { %874 = dma.done.wait (%p986_p8), %s267_s8, 512  }
  0x92   : > { %876 = vsyncadd (%p986_p8), %s267_s8, 4294966784  ;;  %vm333_vm0 = vcmask 7168   ;;  %v914_v0 = vmov 0.0   ;;  %v336_v1 = vld [vmem:[%s260_s21] sm:$0xff]  ;;  %s280_s9 = scalar_lea.vmem [#allocation8], %s615_s30  ;;  %v337_v7 = vld [vmem:[%s260_s21 + $0x8] sm:$0xff]  ;;  %v375_v22 = vlaneseq }
  0x93   : > { %334 = vst.msk [vmem:[#allocation2] sm:$0xff] %vm333_vm0, %v914_v0  ;;  %v338_v2 = vld [vmem:[%s270_s10] sm:$0xff]  ;;  %v346_v6 = vmul.f32 2.0, %v336_v1  ;;  %v339_v8 = vld [vmem:[%s270_s10 + $0x8] sm:$0xff]  ;;  %v347_v11 = vmul.f32 2.0, %v337_v7  ;;  %vm354_vm1 = vcmask 261120  }
  0x94   : > { %335 = vst.msk [vmem:[#allocation2 + $0x8] sm:$0xff] %vm333_vm0, %v914_v0  ;;  %v340_v3 = vld [vmem:[%s280_s9] sm:$0xff]  ;;  %v341_v9 = vld [vmem:[%s280_s9 + $0x8] sm:$0xff]  ;;  %s619_s18 = sshll.u32 %s895_s15, 4  ;;  %v1158_v25 = vshrl.u32 %v375_v22, 7  ;;  %s618_s24 = sshll.u32 %s1141_s28, 3 }
  0x95   : > { %v342_v4 = vsub.f32 %v338_v2, %v340_v3  ;;  %v344_v5 = vadd.f32 %v340_v3, %v338_v2  ;;  %v345_v10 = vadd.f32 %v341_v9, %v339_v8  ;;  %v343_v14 = vsub.f32 %v339_v8, %v341_v9  ;;  %s623_s29 = sshll.u32 %s895_s15, 3  ;;  %s313_s6 = scalar_lea.vmem [#allocation9], %s618_s24 }
  0x96   : > { %v379_v27 = vstv %s619_s18  ;;  %v377_v30 = vadd.s32 8, %v1158_v25  ;;  %s457_s19 = scalar_lea.hbm %s1222_s3, %s623_s29  ;;  %vm438_vm12 = vcmp.eq.s32.totalorder %v1158_v25, 2  ;;  %s459_s30 = sshll.u32 %s313_s6, 4  ;;  %vm437_vm13 = vcmp.eq.s32.totalorder %v1158_v25, 1  ;;  %s460_s30 = int_to_ptr.vmem [resolvable:$true] %s459_s30 }
  0x97   : > { %v348_v12 = vsub.f32 %v344_v5, %v346_v6  ;;  %v349_v15 = vsub.f32 %v345_v10, %v347_v11  ;;  %v380_v31 = vadd.s32 %v379_v27, %v1158_v25  ;;  %s461_s21 = sshll.u32 %s457_s19, 4  ;;  %vm436_vm14 = vcmp.eq.s32.totalorder %v1158_v25, 0  ;;  %s447_s15 = scalar_lea.sflag [#allocation5], %s1141_s28  ;;  %s462_s21 = int_to_ptr.hbm [resolvable:$true] %s461_s21 }
  0x98   : > { %v381_v32 = vadd.s32 %v379_v27, %v377_v30  ;;  %s831_s5 = sshra.s32 %s462_s21, 4  ;;  %s837_s18 = scalar_lea.hbm %s1222_s3, 16  ;;  %s832_s5 = int_to_ptr.hbm [resolvable:$true] %s831_s5 }
  0x99   : > { %v350_v13 = vmul.f32 %v348_v12, %v342_v4  ;;  %v351_v17 = vmul.f32 %v349_v15, %v343_v14  ;;  %vm382_vm4 = vcmp.lt.s32.totalorder %v380_v31, 20  ;;  %s833_s8 = scalar_lea.hbm %s832_s5, 8  ;;  %p838_p3 = scmp.lt.s32.totalorder %s832_s5, %s1222_s3 }
  0x9a   : > { %v352_v19 = vld [vmem:[#allocation2] sm:$0xff]  ;;  %vm383_vm7 = vcmp.lt.s32.totalorder %v381_v32, 20  ;;  %p834_p8 = scmp.ne.s32.totalorder %s832_s5, %s833_s8  ;;  %p839_p5 = scmp.lt.s32.totalorder %s837_s18, %s833_s8 }
  0x9b   : > { %v355_v16 = vsel %vm354_vm1, %v350_v13, 0.0  ;;  %v358_v18 = vsel %vm354_vm1, %v351_v17, 0.0  ;;  %v353_v23 = vld [vmem:[#allocation2 + $0x8] sm:$0xff] }
  0x9c   : > { %356 = vadd.xlane.f32.xlu0 %v355_v16  ;;  %p835_p4 = pnand %p834_p8, %p990_p9  ;;  %p840_p6 = por %p839_p5, %p838_p3 }
  0x9e   : > { %p836_p2 = pneg %p835_p4 }
  0xa0   : > { %p841_p7 = pnand %p840_p6, %p836_p2 }
  0xa4   : > { %359 = vadd.xlane.f32.xlu0 %v358_v18 }
 0x10f   : > { %v357_v20 = vpop.xlane.xlu0 %356 }
 0x110   : > { %v361_v21 = vadd.f32 %v357_v20, %v352_v19 }
 0x112   : > { %364 = vst.msk [vmem:[#allocation2] sm:$0xff] %vm333_vm0, %v361_v21 }
 0x117   : > { %v360_v24 = vpop.xlane.xlu0 %359 }
 0x118   : > { %v362_v26 = vadd.f32 %v360_v24, %v353_v23 }
 0x119   : > { %v369_v28 = vld [vmem:[#allocation2] sm:$0xff] }
 0x11a   : > { %365 = vst.msk [vmem:[#allocation2 + $0x8] sm:$0xff] %vm333_vm0, %v362_v26  ;;  %v371_v29 = vadd.f32 1.0, %v369_v28 }
 0x11c   : > { %vm398_vm2 = vcmp.gt.f32.partialorder %v371_v29, 0.0  ;;  %vm400_vm3 = vcmp.lt.f32.partialorder %v371_v29, 1.0  ;;  %v373_v33 = vmax.f32 %v371_v29, 0.0 }
 0x11d   : > { %vm402_vm5 = vmand %vm398_vm2, %vm400_vm3 }
 0x11e   : > { %vm1163_vm6 = vmand %vm402_vm5, %vm382_vm4  ;;  %v384_v38 = vsel %vm382_vm4, %v373_v33, 0.0 }
 0x11f   : > { %v620_v39 = vsel %vm1163_vm6, 1.0, %v914_v0  ;;  %v386_v41 = vsel %vm333_vm0, %v384_v38, 0.0  ;;  %v406_v49 = vsel %vm1163_vm6, %v384_v38, 0.0 }
 0x120   : > { %v424_v45 = vsel %vm333_vm0, %v620_v39, 0.0  ;;  %v408_v51 = vsel %vm333_vm0, %v406_v49, 0.0 }
 0x121   : > { %v370_v34 = vld [vmem:[#allocation2 + $0x8] sm:$0xff] }
 0x122   : > { %v372_v35 = vadd.f32 1.0, %v370_v34 }
 0x124   : > { %v374_v37 = vmax.f32 %v372_v35, 0.0  ;;  %vm399_vm8 = vcmp.gt.f32.partialorder %v372_v35, 0.0  ;;  %vm401_vm9 = vcmp.lt.f32.partialorder %v372_v35, 1.0 }
 0x125   : > { %vm403_vm10 = vmand %vm399_vm8, %vm401_vm9 }
 0x126   : > { %v385_v40 = vsel %vm383_vm7, %v374_v37, 0.0  ;;  %vm405_vm11 = vmand %vm403_vm10, %vm383_vm7 }
 0x127   : > { %v387_v42 = vsel %vm333_vm0, %v385_v40, 0.0  ;;  %v621_v43 = vsel %vm405_vm11, 1.0, %v914_v0  ;;  %v407_v48 = vsel %vm405_vm11, %v385_v40, 0.0 }
 0x128   : > { %v388_v44 = vadd.f32 %v387_v42, %v386_v41  ;;  %v425_v46 = vsel %vm333_vm0, %v621_v43, 0.0  ;;  %v409_v50 = vsel %vm333_vm0, %v407_v48, 0.0 }
 0x129   : > { %v426_v47 = vadd.f32 %v425_v46, %v424_v45  ;;  %v410_v52 = vadd.f32 %v409_v50, %v408_v51 }
 0x12a   : > { %389 = vadd.xlane.f32.xlu1 %v388_v44 }
 0x12b   : > { %427 = vadd.xlane.f32.xlu2 %v426_v47 }
 0x132   : > { %411 = vadd.xlane.f32.xlu1 %v410_v52 }
 0x19d   : > { %v390_v53 = vpop.xlane.xlu1 %389 }
 0x19e   : > { %v391_v54 = vrot.slane %v390_v53, 4  ;;  %v428_v55 = vpop.xlane.xlu2 %427 }
 0x19f   : > { %v429_v56 = vrot.slane %v428_v55, 4 }
 0x1a0   : > { %v392_v57 = vadd.f32 %v391_v54, %v390_v53 }
 0x1a1   : > { %v430_v58 = vadd.f32 %v429_v56, %v428_v55 }
 0x1a2   : > { %v393_v59 = vrot.slane %v392_v57, 2 }
 0x1a3   : > { %v431_v61 = vrot.slane %v430_v58, 2 }
 0x1a4   : > { %v394_v60 = vadd.f32 %v393_v59, %v392_v57 }
 0x1a5   : > { %v412_v62 = vpop.xlane.xlu1 %411  ;;  %v432_v3 = vadd.f32 %v431_v61, %v430_v58 }
 0x1a6   : > { %v413_v63 = vrot.slane %v412_v62, 4  ;;  %v395_v0 = vrot.slane %v394_v60, 1 }
 0x1a7   : > { %v433_v6 = vrot.slane %v432_v3, 1 }
 0x1a8   : > { %v414_v1 = vadd.f32 %v413_v63, %v412_v62  ;;  %v396_v2 = vadd.f32 %v395_v0, %v394_v60 }
 0x1a9   : > { %v434_v9 = vadd.f32 %v433_v6, %v432_v3 }
 0x1aa   : > { %v415_v4 = vrot.slane %v414_v1, 2  ;;  %629 = vpush %v396_v2 }
 0x1ac   : > { %v416_v5 = vadd.f32 %v415_v4, %v414_v1 }
 0x1ae   : > { %v417_v7 = vrot.slane %v416_v5, 1 }
 0x1b0   : > { %v418_v8 = vadd.f32 %v417_v7, %v416_v5 }
 0x1b2   : > { %631 = vpush %v418_v8 }
 0x1b3   : > { %633 = vpush %v434_v9 }
 0x1db   : > { %s630_s11 = spop %629 }
 0x1dc   : > { %v443_v13 = vstv %s630_s11 }
 0x1e3   : > { %s632_s23 = spop %631 }
 0x1e4   : > { %v441_v10 = vstv %s632_s23  ;;  %s634_s22 = spop %633 }
 0x1e5   : > { %v439_v11 = vstv %s634_s22 }
 0x1e6   : > { %v440_v12 = vsel %vm438_vm12, %v439_v11, 0.0 }
 0x1e7   : > { %v442_v14 = vsel %vm437_vm13, %v441_v10, %v440_v12 }
 0x1e8   : > { %v444_v15 = vsel %vm436_vm14, %v443_v13, %v442_v14 }
 0x1e9   : > { %445 = vst [vmem:[%s313_s6] sm:$0xff] %v444_v15 }
 0x1ea   : > { %844 = shalt.err (!%p841_p7)
}
 0x1eb   : > { %638 = dma.vmem_to_hbm [thread:$0]  (%p990_p9), %s460_s30, 128, %s462_s21, %s447_s15  }
 0x1ec PF: > { %s473_s28 = sand.u32 1, %s883_s12   ;;  %p641_p0 = pnand %p592_p12, %p997_p11 }
 0x1ed   : > { %s474_s7 = scalar_lea.sflag [#allocation5], %s473_s28 }
 0x1ee   : > { %p642_p10 = pneg %p641_p0 }
 0x1f0   : > { %878 = dma.done.wait (%p642_p10), %s474_s7, 128  }
 0x1f1   : > { %880 = vsyncadd (%p642_p10), %s474_s7, 4294967168  ;;  %s22_s17 = sadd.s32 1, %s903_s17   ;;  %s1236_s12 = smov %s887_s13 }
 0x1f2   : > { %p19_p13 = scmp.ge.s32.totalorder %s22_s17, 4   ;;  %s1237_s13 = smov %s891_s14 }
 0x1f3   : > { %s1238_s14 = smov %s995_s26  ;;  %s1239_s15 = smov %s899_s16 }
 0x1f4   : > { %s1240_s16 = smov %s1242_s20  ;;  %21 = sbr.rel (!%p19_p13) target bundleno = 8 (0x8), region = 109 }
 0x1f9   :  { %480 = vsyncpa [#allocation4], 1 }
 0x1fa   :  { %482 = vsyncpa [#allocation4 + $0x1], 1 }
 0x1fb   :  { %483 = vsyncpa [#allocation7], 1 }
 0x1fc   :  { %485 = vsyncpa [#allocation7 + $0x1], 1 }
 0x1fd   :  { %486 = vsyncpa [#allocation5], 1 }
 0x1fe   :  { %488 = vsyncpa [#allocation5 + $0x1], 1 }

</bundles_post_ra>
